<compile_context>
chip_gen: v7x
topology: tpu7x:2x2x1
jax: 0.10.0
libtpu: 0.0.40
codegen_flags: <defaults>
</compile_context>

<pallas_src>
import numpy as np
import jax
import jax.numpy as jnp
from jax import lax
from jax.experimental import pallas as pl
from jax.experimental.pallas import tpu as pltpu


_VMEM_TARGET = 40 * 1024 * 1024   # conservative vs. v7x's 64 MiB physical VMEM


def _round_up(x, m):
    return ((x + m - 1) // m) * m


def _make_value_kernel(activ_fn):
    def _value_kernel(h_ref, w1_ref, b1_ref, w2_ref, b2_ref, o_ref):
        # Cast to bf16 in-kernel (no separate HBM convert pass in the wrapper).
        h = h_ref[...].astype(jnp.bfloat16)
        # First linear on the MXU: (TB, F) bf16 @ (F, 512) bf16 -> f32 accumulate.
        z1 = jnp.dot(h, w1_ref[...], preferred_element_type=jnp.float32)
        # Bias + activation in f32 on the VPU.
        a1 = activ_fn(z1 + b1_ref[...])
        # Value head on the MXU, contracting the hidden axis:
        # (1, H) x (TB, H) -> (1, TB).  Output stays lane-dense.
        v = lax.dot_general(w2_ref[...], a1,
                            (((1,), (1,)), ((), ())),
                            preferred_element_type=jnp.float32)
        # b2 is a scalar living in SMEM.
        o_ref[...] = (v + b2_ref[0]).astype(o_ref.dtype)

    return _value_kernel


def _vmem_budget(tb, Fp, H, h_itemsize):
    return (2 * tb * Fp * h_itemsize     # double-buffered h tiles
            + 2 * Fp * H * 2             # double-buffered bf16 W1
            + 2 * tb * H * 4             # f32 z1/a1 intermediates (approx)
            + 4 * H * 4                  # b1, w2 (double-buffered, tiny)
            + 2 * tb * 4)                # lane-dense output tile


def _choose_tile(B, Fp, H, h_itemsize):
    """Pick a batch tile: big enough to amortize per-step overhead, small
    enough for v7x VMEM, and >= 2 grid steps for medium/large batches so the
    'parallel' axis can shard across v7x's two TensorCores."""
    if B < 512:
        return B, B                      # single full tile, no padding
    tb = 4096
    while tb > 256 and _vmem_budget(tb, Fp, H, h_itemsize) > _VMEM_TARGET:
        tb //= 2
    tb = min(tb, _round_up(pl.cdiv(B, 2), 256))   # guarantee >= 2 grid steps
    b_pad = _round_up(B, tb)
    return tb, b_pad


def value_estimator_forward(h, w1, b1, w2, b2,
                            activ_fn=lambda x: jnp.maximum(x, 0.0)):
    """Forward pass of ValueEstimator.

    Args:
      h:  (B, F) input features (f32 or bf16).
      w1: (F, 512) first linear weight (pre-transposed from PyTorch (512, F)).
      b1: (1, 512) first linear bias.
      w2: (1, 512) value-head weight (PyTorch layout, lane-major).
      b2: (1,) value-head bias.

    Returns:
      (B,) float32 value estimates.
    """
    B, F = h.shape
    H = w1.shape[1]
    assert w1.shape == (F, H)
    assert b1.shape == (1, H)
    assert w2.shape == (1, H)

    # Pad the contraction axis to a multiple of 128 (MXU depth) when needed.
    Fp = _round_up(F, 128) if F % 128 != 0 else F
    if Fp != F:
        w1 = jnp.pad(w1, ((0, Fp - F), (0, 0)))

    # bf16 weight for the MXU (halves W1 HBM traffic); post-matmul math in f32.
    w1_bf = w1.astype(jnp.bfloat16)
    b1 = b1.astype(jnp.float32)
    w2 = w2.astype(jnp.float32)
    b2 = jnp.asarray(b2, dtype=jnp.float32).reshape((1,))

    tb, b_pad = _choose_tile(B, Fp, H, h.dtype.itemsize)
    pad_rows, pad_cols = b_pad - B, Fp - F
    if pad_rows or pad_cols:
        h = jnp.pad(h, ((0, pad_rows), (0, pad_cols)))

    vmem_limit = int(min(48 * 1024 * 1024,
                         max(32 * 1024 * 1024,
                             1.25 * _vmem_budget(tb, Fp, H, h.dtype.itemsize))))

    kernel = _make_value_kernel(activ_fn)

    out = pl.pallas_call(
        kernel,
        out_shape=jax.ShapeDtypeStruct((1, b_pad), jnp.float32),
        grid=(b_pad // tb,),
        in_specs=[
            pl.BlockSpec((tb, Fp), lambda i: (i, 0)),       # h tiles stream over B
            pl.BlockSpec((Fp, H), lambda i: (0, 0)),        # W1 resident in VMEM
            pl.BlockSpec((1, H), lambda i: (0, 0)),         # b1 resident
            pl.BlockSpec((1, H), lambda i: (0, 0)),         # w2 resident, lane-major
            pl.BlockSpec(memory_space=pltpu.MemorySpace.SMEM),  # b2 scalar in SMEM
        ],
        out_specs=pl.BlockSpec((1, tb), lambda i: (0, i)),  # lane-dense output
        compiler_params=pltpu.CompilerParams(
            dimension_semantics=("parallel",),              # shard B across TCs (v7x)
            vmem_limit_bytes=vmem_limit,
        ),
    )(h, w1_bf, b1, w2, b2)

    # PyTorch: self.value(h).reshape(-1); drop any padded rows.
    return out.reshape(-1)[:B]


def _orthogonal(key, shape, gain):
    """Deterministic orthogonal init matching nn.init.orthogonal_ semantics."""
    rows, cols = shape
    n = max(rows, cols)
    a = jax.random.normal(key, (n, n), dtype=jnp.float32)
    q, r = jnp.linalg.qr(a)
    q = q * jnp.sign(jnp.diag(r))[None, :]
    return gain * q[:rows, :cols]


def make_params(key, in_features, hidden=512):
    k1, k2, k3, k4 = jax.random.split(key, 4)
    # PyTorch stores Linear weight as (out, in); orthogonal_ acts on that shape.
    w1_pt = _orthogonal(k1, (hidden, in_features), gain=float(np.sqrt(2.0)))
    w2_pt = _orthogonal(k2, (1, hidden), gain=1.0)
    w1 = jnp.transpose(w1_pt)                      # (F, 512) for row-major matmul
    w2 = w2_pt                                     # (1, 512) lane-major
    # PyTorch Linear default bias init: U(-1/sqrt(fan_in), 1/sqrt(fan_in)).
    bnd1 = 1.0 / np.sqrt(in_features)
    bnd2 = 1.0 / np.sqrt(hidden)
    b1 = jax.random.uniform(k3, (1, hidden), minval=-bnd1, maxval=bnd1,
                            dtype=jnp.float32)
    b2 = jax.random.uniform(k4, (1,), minval=-bnd2, maxval=bnd2,
                            dtype=jnp.float32)
    return w1, b1, w2, b2


if __name__ == "__main__":
    key = jax.random.PRNGKey(0)
    k_in, k_params = jax.random.split(key)

    B, F = 8, 32                       # small batch of feature vectors
    h = jax.random.normal(k_in, (B, F), dtype=jnp.float32)
    w1, b1, w2, b2 = make_params(k_params, F)

    value = value_estimator_forward(h, w1, b1, w2, b2)
    jax.block_until_ready(value)

    # Pure-JAX f32 reference (kernel matmul inputs are bf16 with f32
    # accumulation, so tolerance is loosened accordingly).
    ref = jnp.maximum(h @ w1 + b1, 0.0) @ w2.T + b2
    ref = ref.reshape(-1)
    assert value.shape == (B,)
    np.testing.assert_allclose(np.asarray(value), np.asarray(ref),
                               rtol=2e-2, atol=2e-2)

    print("KERNEL_OK")
</pallas_src>

<mosaic_0001>
module attributes {stable_mosaic.version = 11 : i64} {
  func.func @_value_kernel(%arg0: i32, %arg1: memref<8x128xf32, #tpu.memory_space<vmem>>, %arg2: memref<128x512xbf16, #tpu.memory_space<vmem>>, %arg3: memref<1x512xf32, #tpu.memory_space<vmem>>, %arg4: memref<1x512xf32, #tpu.memory_space<vmem>>, %arg5: memref<1xf32, #tpu.memory_space<smem>>, %arg6: memref<1x8xf32, #tpu.memory_space<vmem>>) attributes {dimension_semantics = [#tpu.dimension_semantics<parallel>], iteration_bounds = array<i64: 1>, scalar_prefetch = 0 : i64, scratch_operands = 0 : i64, tpu.core_type = #tpu.core_type<tc>, window_params = [{transform_indices = @transform_0, window_bounds = array<i64: 8, 128>}, {pipeline_mode = #tpu.pipeline_mode<synchronous>, transform_indices = @transform_1, window_bounds = array<i64: 128, 512>}, {pipeline_mode = #tpu.pipeline_mode<synchronous>, transform_indices = @transform_2, window_bounds = array<i64: 1, 512>}, {pipeline_mode = #tpu.pipeline_mode<synchronous>, transform_indices = @transform_3, window_bounds = array<i64: 1, 512>}, {transform_indices = @transform_4, window_bounds = array<i64: 1>}, {transform_indices = @transform_5, window_bounds = array<i64: 1, 8>}]} {
    %c0 = arith.constant 0 : index
    %c0_0 = arith.constant 0 : index
    %0 = vector.load %arg1[%c0, %c0_0] : memref<8x128xf32, #tpu.memory_space<vmem>>, vector<8x128xf32>
    %1 = arith.truncf %0 : vector<8x128xf32> to vector<8x128xbf16>
    %c0_1 = arith.constant 0 : index
    %c0_2 = arith.constant 0 : index
    %2 = vector.load %arg2[%c0_1, %c0_2] : memref<128x512xbf16, #tpu.memory_space<vmem>>, vector<128x512xbf16>
    %cst = arith.constant dense<0.000000e+00> : vector<8x512xf32>
    %3 = tpu.matmul %1, %2, %cst {dimension_numbers = #tpu.dot_dimension_numbers<[1], [0], [0], [1], [0, 0, 1, 1], [], []>} : vector<8x128xbf16>, vector<128x512xbf16>, vector<8x512xf32> -> vector<8x512xf32>
    %c0_3 = arith.constant 0 : index
    %c0_4 = arith.constant 0 : index
    %4 = vector.load %arg3[%c0_3, %c0_4] : memref<1x512xf32, #tpu.memory_space<vmem>>, vector<1x512xf32>
    %5 = vector.broadcast %4 : vector<1x512xf32> to vector<8x512xf32>
    %6 = arith.addf %3, %5 : vector<8x512xf32>
    %cst_5 = arith.constant 0.000000e+00 : f32
    %7 = vector.broadcast %cst_5 : f32 to vector<8x512xf32>
    %8 = arith.maximumf %6, %7 : vector<8x512xf32>
    %c0_6 = arith.constant 0 : index
    %c0_7 = arith.constant 0 : index
    %9 = vector.load %arg4[%c0_6, %c0_7] : memref<1x512xf32, #tpu.memory_space<vmem>>, vector<1x512xf32>
    %cst_8 = arith.constant dense<0.000000e+00> : vector<1x8xf32>
    %10 = tpu.matmul %9, %8, %cst_8 {dimension_numbers = #tpu.dot_dimension_numbers<[1], [1], [0], [0], [0, 0, 1, 0], [], []>} : vector<1x512xf32>, vector<8x512xf32>, vector<1x8xf32> -> vector<1x8xf32>
    %c0_9 = arith.constant 0 : index
    %11 = memref.load %arg5[%c0_9] : memref<1xf32, #tpu.memory_space<smem>>
    %12 = vector.broadcast %11 : f32 to vector<1x8xf32>
    %13 = arith.addf %10, %12 : vector<1x8xf32>
    %c0_10 = arith.constant 0 : index
    %c0_11 = arith.constant 0 : index
    %14 = vector.load %arg6[%c0_10, %c0_11] : memref<1x8xf32, #tpu.memory_space<vmem>>, vector<1x8xf32>
    tpu.vector_store %arg6[%c0_10, %c0_11], %13 {strides = array<i32>} : memref<1x8xf32, #tpu.memory_space<vmem>>, vector<1x8xf32>,
    return
  }
  func.func @transform_0(%arg0: i32) -> (i32, i32) {
    %c0_i32 = arith.constant 0 : i32
    %c0_i32_0 = arith.constant 0 : i32
    return %arg0, %c0_i32 : i32, i32
  }
  func.func @transform_1(%arg0: i32) -> (i32, i32) {
    %c0_i32 = arith.constant 0 : i32
    %c0_i32_0 = arith.constant 0 : i32
    %c0_i32_1 = arith.constant 0 : i32
    return %c0_i32, %c0_i32_0 : i32, i32
  }
  func.func @transform_2(%arg0: i32) -> (i32, i32) {
    %c0_i32 = arith.constant 0 : i32
    %c0_i32_0 = arith.constant 0 : i32
    %c0_i32_1 = arith.constant 0 : i32
    return %c0_i32, %c0_i32_0 : i32, i32
  }
  func.func @transform_3(%arg0: i32) -> (i32, i32) {
    %c0_i32 = arith.constant 0 : i32
    %c0_i32_0 = arith.constant 0 : i32
    %c0_i32_1 = arith.constant 0 : i32
    return %c0_i32, %c0_i32_0 : i32, i32
  }
  func.func @transform_4(%arg0: i32) -> i32 {
    %c0_i32 = arith.constant 0 : i32
    %c0_i32_0 = arith.constant 0 : i32
    return %c0_i32 : i32
  }
  func.func @transform_5(%arg0: i32) -> (i32, i32) {
    %c0_i32 = arith.constant 0 : i32
    %c0_i32_0 = arith.constant 0 : i32
    return %c0_i32, %arg0 : i32, i32
  }
}

</mosaic_0001>

<bundles_post_ra>
// kernel: tpu_custom_call.1
= control target key start
LH: loop header
LB: loop body
LE: loop exit
PB: predicated region body
PF: predicated region fallthrough
CT: control target
= control target key end

     0   :  { %11 = vsyncpa [#allocation4], 0  ;;  %s781_s0 = inlined_call_operand.hbm [shape: f32[8,128], index: 0, kind: input, shape index: {}]   ;;  %s782_s1 = inlined_call_operand.hbm [shape: bf16[128,512], index: 1, kind: input, shape index: {}]   ;;  %s783_s2 = inlined_call_operand.vmem [shape: f32[1,512], index: 2, kind: input, shape index: {}]   ;;  %s784_s3 = inlined_call_operand.vmem [shape: f32[1,512], index: 3, kind: input, shape index: {}]   ;;  %s785_s4 = inlined_call_operand.<no memory space> [shape: f32[1], index: 4, kind: input, shape index: {}]   ;;  %s786_s5 = inlined_call_operand.hbm [shape: f32[1,8], index: 5, kind: output, shape index: {}]  }
   0x1   :  { %12 = vsyncpa [#allocation7], 0 }
   0x2   :  { %13 = vsyncpa [#allocation5], 0  ;;  %s693_s18 = smov [#allocation3]   ;;  %s694_s20 = smov [#allocation6]  }
   0x3   :  { %s20_s19 = sshll.u32 %s693_s18, 4  ;;  %s29_s21 = sshll.u32 %s694_s20, 4  ;;  %s21_s19 = int_to_ptr.vmem [resolvable:$true] %s20_s19  ;;  %s729_s21 = int_to_ptr.vmem [resolvable:$true] %s29_s21 }
   0x4   :  { %s621_s24 = scalar_lea.hbm %s781_s0, 128 }
   0x5   :  { %p622_p0 = scmp.ne.s32.totalorder %s781_s0, %s621_s24  ;;  %p625_p1 = scmp.lt.u32.totalorder %s621_s24, %s781_s0 }
   0x7   :  { %p627_p2 = pnand %p625_p1, %p622_p0 }
   0x9   :  { %630 = shalt.err (!%p627_p2)
}
   0xa   :  { %s631_s29 = scalar_lea.vmem %s21_s19, 128  ;;  %p636_p4 = scmp.lt.s32.totalorder %s21_s19, %s21_s19 }
   0xb   :  { %p632_p3 = scmp.ne.s32.totalorder %s21_s19, %s631_s29  ;;  %p637_p5 = scmp.lt.s32.totalorder %s631_s29, %s631_s29 }
   0xd   :  { %p638_p6 = por %p637_p5, %p636_p4 }
   0xf   :  { %p639_p7 = pnand %p638_p6, %p632_p3 }
  0x11   :  { %642 = shalt.err (!%p639_p7)
}
  0x12   :  { %23 = dma.hbm_to_vmem [thread:$0]  %s781_s0, 128, %s21_s19, [#allocation4]  }
  0x13   :  { %s643_s9 = scalar_lea.hbm %s782_s1, 4096 }
  0x14   :  { %p644_p8 = scmp.ne.s32.totalorder %s782_s1, %s643_s9  ;;  %p647_p9 = scmp.lt.u32.totalorder %s643_s9, %s782_s1 }
  0x16   :  { %p649_p10 = pnand %p647_p9, %p644_p8 }
  0x18   :  { %652 = shalt.err (!%p649_p10)
}
  0x19   :  { %s653_s14 = scalar_lea.vmem %s729_s21, 4096  ;;  %p658_p12 = scmp.lt.s32.totalorder %s729_s21, %s729_s21 }
  0x1a   :  { %p654_p11 = scmp.ne.s32.totalorder %s729_s21, %s653_s14  ;;  %p659_p13 = scmp.lt.s32.totalorder %s653_s14, %s653_s14 }
  0x1c   :  { %p660_p0 = por %p659_p13, %p658_p12 }
  0x1e   :  { %p661_p1 = pnand %p660_p0, %p654_p11 }
  0x20   :  { %664 = shalt.err (!%p661_p1)
}
  0x21   :  { %s695_s0 = smov 256   ;;  %s696_s15 = smov 16  }
  0x22   :  { %35 = dma.hbm_to_vmem [thread:$0]  %s782_s1, 4096, %s729_s21, [#allocation7], %s695_s0, %s695_s0, %s696_s15  }
  0x23   :  { %687 = dma.done.wait [#allocation4], 128  }
  0x24   :  { %688 = vsyncadd [#allocation4], 4294967168 }
  0x25   :  { %689 = dma.done.wait [#allocation7], 4096  }
  0x26   :  { %690 = vsyncadd [#allocation7], 4294963200  ;;  %v697_v0 = vmov 0   ;;  %v573_v1 = vld [vmem:[#allocation6 + $0x4] ss:$16 sps:$4 sm:$0xff]   ;;  %v49_v33 = vld [vmem:[#allocation3] sm:$0xff]  ;;  %v85_v35 = vlaneseq }
  0x27   :  { %297 = vmatprep.mubr.bf16.mxu0 %v697_v0  ;;  %338 = vmatprep.mubr.bf16.mxu1 %v697_v0  ;;  %v575_v2 = vld [vmem:[#allocation6 + $0xc] ss:$16 sps:$4 sm:$0xff]   ;;  %v577_v3 = vld [vmem:[#allocation6] ss:$16 sps:$4 sm:$0xff]   ;;  %v578_v4 = vld [vmem:[#allocation6 + $0x8] ss:$16 sps:$4 sm:$0xff]   ;;  %v50_v34 = vpack.c.bf16 %v49_v33, %v49_v33 }
  0x28   :  { %265 = vmatprep.subr.bf16.mxu0 %v573_v1  ;;  %306 = vmatprep.subr.bf16.mxu1 %v575_v2  ;;  %v579_v5 = vld [vmem:[#allocation6 + $0x24] ss:$16 sps:$4 sm:$0xff]   ;;  %v581_v6 = vld [vmem:[#allocation6 + $0x2c] ss:$16 sps:$4 sm:$0xff]   ;;  %v583_v7 = vld [vmem:[#allocation6 + $0x20] ss:$16 sps:$4 sm:$0xff]  }
  0x29   :  { %266 = vmatpush1.bf16.msra.mxu0 %v577_v3  ;;  %307 = vmatpush1.bf16.msra.mxu1 %v578_v4  ;;  %v584_v8 = vld [vmem:[#allocation6 + $0x28] ss:$16 sps:$4 sm:$0xff]   ;;  %v585_v9 = vld [vmem:[#allocation6 + $0x44] ss:$16 sps:$4 sm:$0xff]   ;;  %v587_v10 = vld [vmem:[#allocation6 + $0x4c] ss:$16 sps:$4 sm:$0xff]   ;;  %v353_v3 = vstv %s785_s4 }
  0x2a   :  { %267 = vmatprep.subr.bf16.mxu0 %v579_v5  ;;  %308 = vmatprep.subr.bf16.mxu1 %v581_v6  ;;  %v589_v11 = vld [vmem:[#allocation6 + $0x40] ss:$16 sps:$4 sm:$0xff]   ;;  %v590_v12 = vld [vmem:[#allocation6 + $0x48] ss:$16 sps:$4 sm:$0xff]   ;;  %v591_v13 = vld [vmem:[#allocation6 + $0x64] ss:$16 sps:$4 sm:$0xff]  }
  0x2b   :  { %v593_v14 = vld [vmem:[#allocation6 + $0x6c] ss:$16 sps:$4 sm:$0xff]   ;;  %v595_v15 = vld [vmem:[#allocation6 + $0x60] ss:$16 sps:$4 sm:$0xff]   ;;  %v596_v16 = vld [vmem:[#allocation6 + $0x68] ss:$16 sps:$4 sm:$0xff]  }
  0x2c   :  { %v597_v17 = vld [vmem:[#allocation6 + $0x84] ss:$16 sps:$4 sm:$0xff]   ;;  %v599_v18 = vld [vmem:[#allocation6 + $0x8c] ss:$16 sps:$4 sm:$0xff]   ;;  %v601_v19 = vld [vmem:[#allocation6 + $0x80] ss:$16 sps:$4 sm:$0xff]  }
  0x2d   :  { %268 = vmatpush1.bf16.msra.mxu0 %v583_v7  ;;  %309 = vmatpush1.bf16.msra.mxu1 %v584_v8  ;;  %v602_v20 = vld [vmem:[#allocation6 + $0x88] ss:$16 sps:$4 sm:$0xff]   ;;  %v603_v21 = vld [vmem:[#allocation6 + $0xa4] ss:$16 sps:$4 sm:$0xff]   ;;  %v605_v22 = vld [vmem:[#allocation6 + $0xac] ss:$16 sps:$4 sm:$0xff]  }
  0x2e   :  { %269 = vmatprep.subr.bf16.mxu0 %v585_v9  ;;  %310 = vmatprep.subr.bf16.mxu1 %v587_v10  ;;  %v607_v23 = vld [vmem:[#allocation6 + $0xa0] ss:$16 sps:$4 sm:$0xff]   ;;  %v608_v24 = vld [vmem:[#allocation6 + $0xa8] ss:$16 sps:$4 sm:$0xff]   ;;  %v609_v25 = vld [vmem:[#allocation6 + $0xc4] ss:$16 sps:$4 sm:$0xff]  }
  0x2f   :  { %v611_v26 = vld [vmem:[#allocation6 + $0xcc] ss:$16 sps:$4 sm:$0xff]   ;;  %v613_v27 = vld [vmem:[#allocation6 + $0xc0] ss:$16 sps:$4 sm:$0xff]   ;;  %v614_v28 = vld [vmem:[#allocation6 + $0xc8] ss:$16 sps:$4 sm:$0xff]  }
  0x30   :  { %v615_v29 = vld [vmem:[#allocation6 + $0xe4] ss:$16 sps:$4 sm:$0xff]   ;;  %v617_v30 = vld [vmem:[#allocation6 + $0xec] ss:$16 sps:$4 sm:$0xff]   ;;  %v619_v31 = vld [vmem:[#allocation6 + $0xe0] ss:$16 sps:$4 sm:$0xff]  }
  0x31   :  { %270 = vmatpush1.bf16.msra.mxu0 %v589_v11  ;;  %311 = vmatpush1.bf16.msra.mxu1 %v590_v12  ;;  %v620_v32 = vld [vmem:[#allocation6 + $0xe8] ss:$16 sps:$4 sm:$0xff]   ;;  %v86_v36 = vshrl.u32 %v85_v35, 7  ;;  %s698_s21 = smov [#allocation8]   ;;  %vm515_vm0 = vcmask 57344  }
  0x32   :  { %271 = vmatprep.subr.bf16.mxu0 %v591_v13  ;;  %312 = vmatprep.subr.bf16.mxu1 %v593_v14  ;;  %v351_v37 = vld [vmem:[%s784_s3] sm:$0xf]  ;;  %s523_s22 = sshll.u32 %s698_s21, 4  ;;  %s524_s22 = int_to_ptr.vmem [resolvable:$true] %s523_s22 }
  0x33   :  { %v91_v38 = vsub.s32 1, %v86_v36  ;;  %v99_v39 = vsub.s32 3, %v86_v36  ;;  %v87_v42 = vsub.s32 0, %v86_v36  ;;  %v95_v43 = vsub.s32 2, %v86_v36  ;;  %v83_v44 = vld [vmem:[%s783_s2] sm:$0xf]  ;;  %p670_p3 = scmp.lt.s32.totalorder %s524_s22, %s524_s22 }
  0x34   :  { %s665_s23 = scalar_lea.vmem %s524_s22, 16  ;;  %s669_s24 = scalar_lea.vmem %s524_s22, 32 }
  0x35   :  { %272 = vmatpush1.bf16.msra.mxu0 %v595_v15  ;;  %313 = vmatpush1.bf16.msra.mxu1 %v596_v16  ;;  %v362_v40 = vrot.slane %v351_v37, %v91_v38  ;;  %v370_v41 = vrot.slane %v351_v37, %v99_v39  ;;  %v88_v45 = vrot.slane %v83_v44, %v87_v42  ;;  %p666_p2 = scmp.ne.s32.totalorder %s524_s22, %s665_s23  ;;  %p671_p4 = scmp.lt.s32.totalorder %s669_s24, %s665_s23 }
  0x36   :  { %273 = vmatprep.subr.bf16.mxu0 %v597_v17  ;;  %314 = vmatprep.subr.bf16.mxu1 %v599_v18  ;;  %v96_v46 = vrot.slane %v83_v44, %v95_v43  ;;  %v92_v47 = vrot.slane %v83_v44, %v91_v38  ;;  %v100_v48 = vrot.slane %v83_v44, %v99_v39 }
  0x37   :  { %v358_v1 = vrot.slane %v351_v37, %v87_v42  ;;  %v366_v2 = vrot.slane %v351_v37, %v95_v43  ;;  %p672_p5 = por %p671_p4, %p670_p3 }
  0x39   :  { %274 = vmatpush1.bf16.msra.mxu0 %v601_v19  ;;  %315 = vmatpush1.bf16.msra.mxu1 %v602_v20  ;;  %p673_p6 = pnand %p672_p5, %p666_p2 }
  0x3a   :  { %275 = vmatprep.subr.bf16.mxu0 %v603_v21  ;;  %316 = vmatprep.subr.bf16.mxu1 %v605_v22 }
  0x3d   :  { %276 = vmatpush1.bf16.msra.mxu0 %v607_v23  ;;  %317 = vmatpush1.bf16.msra.mxu1 %v608_v24 }
  0x3e   :  { %277 = vmatprep.subr.bf16.mxu0 %v609_v25  ;;  %318 = vmatprep.subr.bf16.mxu1 %v611_v26 }
  0x41   :  { %278 = vmatpush1.bf16.msra.mxu0 %v613_v27  ;;  %319 = vmatpush1.bf16.msra.mxu1 %v614_v28 }
  0x42   :  { %279 = vmatprep.subr.bf16.mxu0 %v615_v29  ;;  %320 = vmatprep.subr.bf16.mxu1 %v617_v30 }
  0x45   :  { %280 = vmatpush1.bf16.msra.mxu0 %v619_v31  ;;  %321 = vmatpush1.bf16.msra.mxu1 %v620_v32 }
  0x48   :  { %298 = vmatmul.mubr.bf16.vlgmr.msra.gmra.mrb[0].mxu0 %v50_v34  ;;  %339 = vmatmul.mubr.bf16.vlgmr.msra.gmra.mrb[0].mxu1 %v50_v34 }
  0x49   :  { %439 = vmatprep.mubr.f32.mxu1 %v362_v40  ;;  %509 = vmatprep.mubr.f32.mxu0 %v370_v41 }
 0x11b   :  { %v299_v49 = vpop.f32.mrb[0].mxu0  ;;  %v340_v50 = vpop.f32.mrb[0].mxu1 }
 0x11c   :  { %v300_v51 = vadd.f32 %v299_v49, %v88_v45  ;;  %v341_v52 = vadd.f32 %v340_v50, %v96_v46  ;;  %v301_v53 = vpop.f32.mrb[1].mxu0  ;;  %v342_v54 = vpop.f32.mrb[1].mxu1 }
 0x11d   :  { %v302_v55 = vadd.f32 %v301_v53, %v92_v47  ;;  %v343_v56 = vadd.f32 %v342_v54, %v100_v48  ;;  %v303_v57 = vpop.f32.mrb[2].mxu0  ;;  %v344_v58 = vpop.f32.mrb[2].mxu1 }
 0x11e   :  { %v349_v59 = vmax.f32 %v341_v52, 0.0  ;;  %v304_v60 = vpop.f32.mrb[3].mxu0  ;;  %v345_v61 = vpop.f32.mrb[3].mxu1  ;;  %v347_v0 = vmax.f32 %v300_v51, 0.0 }
 0x11f   :  { %v348_v62 = vmax.f32 %v302_v55, 0.0  ;;  %v350_v63 = vmax.f32 %v343_v56, 0.0 }
 0x121   :  { %375 = vmatprep.subr.mxu1 %v348_v62  ;;  %445 = vmatprep.subr.mxu0 %v350_v63 }
 0x122   :  { %376 = vmatpush1.xpose.msra.mxu1 %v347_v0  ;;  %446 = vmatpush1.xpose.msra.mxu0 %v349_v59 }
 0x125   :  { %440 = vmatmul.mubr.f32.vlgmr.msra.gmra.mrb[4].mxu1 %v358_v1  ;;  %510 = vmatmul.mubr.f32.vlgmr.msra.gmra.mrb[4].mxu0 %v366_v2 }
 0x1f8   :  { %v441_v4 = vpop.f32.mrb[4].mxu1  ;;  %v511_v5 = vpop.f32.mrb[4].mxu0 }
 0x1f9   :  { %v442_v6 = vadd.f32 %v441_v4, %v353_v3  ;;  %v443_v7 = vpop.f32.mrb[5].mxu1  ;;  %v513_v8 = vpop.f32.mrb[5].mxu0 }
 0x1fb   :  { %v512_v9 = vadd.f32 %v511_v5, %v442_v6 }
 0x1fd   :  { %516 = vst.msk [vmem:[#allocation8] sm:$0x1] %vm515_vm0, %v512_v9 }
 0x1fe   :  { %676 = shalt.err (!%p673_p6)
}
 0x1ff   :  { %s677_s26 = scalar_lea.hbm %s786_s5, 16 }
 0x200   :  { %p678_p7 = scmp.ne.s32.totalorder %s786_s5, %s677_s26  ;;  %p681_p8 = scmp.lt.u32.totalorder %s677_s26, %s786_s5 }
 0x202   :  { %p683_p9 = pnand %p681_p8, %p678_p7 }
 0x204   :  { %686 = shalt.err (!%p683_p9)
}
 0x205   :  { %526 = dma.vmem_to_hbm [thread:$0]  %s524_s22, 16, %s786_s5, [#allocation5]  }
 0x206   :  { %691 = dma.done.wait [#allocation5], 16  }
 0x207   :  { %692 = vsyncadd [#allocation5], 4294967280 }
 0x208   :  { %530 = vsyncpa [#allocation4], 1 }
 0x209   :  { %531 = vsyncpa [#allocation7], 1 }
 0x20a   :  { %532 = vsyncpa [#allocation5], 1 }

</bundles_post_ra>
